<compile_context>
chip_gen: v7x
topology: tpu7x:2x2x1
jax: 0.10.0
libtpu: 0.0.40
codegen_flags: <defaults>
</compile_context>

<pallas_src>
import functools
import math

import jax
import jax.numpy as jnp
import numpy as np
from jax.experimental import pallas as pl
from jax.experimental.pallas import tpu as pltpu

LANE = 128      # TPU lane width
SUBLANE = 16    # bf16-safe sublane multiple


# ------------------------------- helpers ----------------------------------- #
def _round_up(v, m):
    return ((v + m - 1) // m) * m


def _pad2(a, rows, cols, dtype):
    return jnp.pad(a, ((0, rows - a.shape[0]),
                       (0, cols - a.shape[1]))).astype(dtype)


def _pad_row(b, cols):
    return jnp.pad(b, (0, cols - b.shape[0])).reshape(1, cols).astype(jnp.float32)


def _vmem_capacity_bytes():
    """Per-core physical VMEM (generation aware); conservative fallback."""
    try:
        return int(pltpu.get_tpu_info().vmem_capacity_bytes)
    except Exception:
        return 64 * 1024 * 1024          # assume v7x-sized VMEM when unknown


def _make_spec(shape, index_map, buffers=None):
    """BlockSpec with optional pipeline depth; safe fallback if unsupported."""
    if buffers is not None:
        try:
            return pl.BlockSpec(shape, index_map,
                                pipeline_mode=pl.Buffered(buffers))
        except Exception:                # older jax: no pipeline_mode/Buffered
            pass
    return pl.BlockSpec(shape, index_map)


# ------------------------------ Pallas kernels ----------------------------- #
def _fused_kernel(a_ref, xw1_ref, b1_ref, w2_ref, b2_ref, wl1_ref, wl2_ref,
                  bl_ref, o_ref):
    """Whole forward with A resident in VMEM (read from HBM once)."""
    bf = xw1_ref.dtype
    h1 = jnp.maximum(
        jnp.dot(a_ref[...], xw1_ref[...], preferred_element_type=jnp.float32)
        + b1_ref[...], 0.0)
    h1b = h1.astype(bf)
    h1w2 = jnp.dot(h1b, w2_ref[...],
                   preferred_element_type=jnp.float32).astype(bf)
    h2 = jnp.maximum(
        jnp.dot(a_ref[...], h1w2, preferred_element_type=jnp.float32)
        + b2_ref[...], 0.0)
    o_ref[...] = (
        jnp.dot(h1b, wl1_ref[...], preferred_element_type=jnp.float32)
        + jnp.dot(h2.astype(bf), wl2_ref[...],
                  preferred_element_type=jnp.float32)
        + bl_ref[...])


def _gcn1_stream_kernel(a_ref, xw1_ref, b1_ref, w2_ref, h1_ref, h1w2_ref,
                        acc_ref):
    """Streaming pass 1: h1 = relu(A @ XW1 + b1); also emit h1W2 = h1 @ W2."""
    k = pl.program_id(1)
    tk = a_ref.shape[1]

    @pl.when(k == 0)
    def _():
        acc_ref[...] = jnp.zeros_like(acc_ref)

    koff = pl.multiple_of(k * tk, tk)
    acc_ref[...] += jnp.dot(a_ref[...], xw1_ref[pl.ds(koff, tk), :],
                            preferred_element_type=jnp.float32)

    @pl.when(k == pl.num_programs(1) - 1)
    def _():
        h1 = jnp.maximum(acc_ref[...] + b1_ref[...], 0.0)
        h1b = h1.astype(h1_ref.dtype)
        h1_ref[...] = h1b
        h1w2_ref[...] = jnp.dot(
            h1b, w2_ref[...],
            preferred_element_type=jnp.float32).astype(h1w2_ref.dtype)


def _gcn2_stream_kernel(a_ref, h1w2_ref, h1_ref, b2_ref, wl1_ref, wl2_ref,
                        bl_ref, o_ref, acc_ref):
    """Streaming pass 2: h2 = relu(A @ h1W2 + b2); out = h1@Wl1 + h2@Wl2 + bl."""
    k = pl.program_id(1)
    tk = a_ref.shape[1]

    @pl.when(k == 0)
    def _():
        acc_ref[...] = jnp.zeros_like(acc_ref)

    koff = pl.multiple_of(k * tk, tk)
    acc_ref[...] += jnp.dot(a_ref[...], h1w2_ref[pl.ds(koff, tk), :],
                            preferred_element_type=jnp.float32)

    @pl.when(k == pl.num_programs(1) - 1)
    def _():
        h2 = jnp.maximum(acc_ref[...] + b2_ref[...], 0.0)
        o_ref[...] = (
            jnp.dot(h1_ref[...], wl1_ref[...],
                    preferred_element_type=jnp.float32)
            + jnp.dot(h2.astype(h1_ref.dtype), wl2_ref[...],
                      preferred_element_type=jnp.float32)
            + bl_ref[...])


# ------------------------------- JAX glue ---------------------------------- #
def gcn_norm_dense(edge_index, num_nodes, dtype=jnp.float32):
    """Dense D^-1/2 (A + I) D^-1/2 so `A_norm @ x` aggregates at targets.

    Graph-structure dependent only: build ONCE per graph and reuse.  Pass
    dtype=jnp.bfloat16 to halve the HBM footprint of the dense matrix.
    """
    # TODO(synk): the data-dependent edge scatter stays in plain JAX; only the
    # dense, matmul-friendly result is consumed by the Pallas kernels.
    row, col = edge_index[0], edge_index[1]
    loop = jnp.arange(num_nodes, dtype=edge_index.dtype)
    row = jnp.concatenate([row, loop])
    col = jnp.concatenate([col, loop])
    w = jnp.ones(row.shape, dtype=jnp.float32)
    deg = jnp.zeros((num_nodes,), jnp.float32).at[col].add(w)
    dinv = jnp.where(deg > 0, jax.lax.rsqrt(deg), 0.0)
    norm = dinv[row] * w * dinv[col]
    a = jnp.zeros((num_nodes, num_nodes), jnp.float32).at[col, row].add(norm)
    return a.astype(dtype)


@functools.partial(jax.jit, static_argnames=("vmem_limit",))
def _gnn_fused(x, a_norm, W1, b1, W2, b2, Wl, bl, *, vmem_limit):
    """Single-call path: A resident in VMEM, read from HBM exactly once."""
    N, _ = x.shape
    H = W1.shape[1]
    Hp = _round_up(H, LANE)
    Nr = _round_up(max(N, SUBLANE), SUBLANE)   # rows & contraction dim of A
    bf16 = jnp.bfloat16

    xw1p = _pad2(x.astype(jnp.float32) @ W1.astype(jnp.float32), Nr, Hp, bf16)
    a_p = _pad2(a_norm, Nr, Nr, bf16)
    w2p = _pad2(W2, Hp, Hp, bf16)
    wl1p = _pad2(Wl[:H], Hp, Hp, bf16)
    wl2p = _pad2(Wl[H:], Hp, Hp, bf16)
    b1p, b2p, blp = _pad_row(b1, Hp), _pad_row(b2, Hp), _pad_row(bl, Hp)

    full = lambda r, c: _make_spec((r, c), lambda i: (0, 0), buffers=1)

    out = pl.pallas_call(
        _fused_kernel,
        out_shape=jax.ShapeDtypeStruct((Nr, Hp), jnp.float32),
        grid=(1,),
        in_specs=[full(Nr, Nr), full(Nr, Hp), full(1, Hp), full(Hp, Hp),
                  full(1, Hp), full(Hp, Hp), full(Hp, Hp), full(1, Hp)],
        out_specs=pl.BlockSpec((Nr, Hp), lambda i: (0, 0)),
        compiler_params=pltpu.CompilerParams(
            dimension_semantics=("arbitrary",),
            vmem_limit_bytes=vmem_limit),
    )(a_p, xw1p, b1p, w2p, b2p, wl1p, wl2p, blp)
    return out[:N, :H]


@functools.partial(jax.jit,
                   static_argnames=("tm", "tk", "a_buffers", "vmem_limit"))
def _gnn_streaming(x, a_norm, W1, b1, W2, b2, Wl, bl, *, tm, tk, a_buffers,
                   vmem_limit):
    """Two-pass path for graphs whose dense A does not fit in VMEM."""
    N, _ = x.shape
    H = W1.shape[1]
    Hp = _round_up(H, LANE)
    lcm = tm * tk // math.gcd(tm, tk)
    P = _round_up(max(N, lcm), lcm)            # rows AND cols of padded A
    bf16 = jnp.bfloat16

    xw1p = _pad2(x.astype(jnp.float32) @ W1.astype(jnp.float32), P, Hp, bf16)
    a_p = _pad2(a_norm, P, P, bf16)
    w2p = _pad2(W2, Hp, Hp, bf16)
    wl1p = _pad2(Wl[:H], Hp, Hp, bf16)
    wl2p = _pad2(Wl[H:], Hp, Hp, bf16)
    b1p, b2p, blp = _pad_row(b1, Hp), _pad_row(b2, Hp), _pad_row(bl, Hp)

    grid = (P // tm, P // tk)                  # (row tiles parallel, K last)
    cparams = pltpu.CompilerParams(
        dimension_semantics=("parallel", "arbitrary"),
        vmem_limit_bytes=vmem_limit)

    a_spec = _make_spec((tm, tk), lambda i, k: (i, k), buffers=a_buffers)
    res = lambda r, c: _make_spec((r, c), lambda i, k: (0, 0), buffers=1)
    row = lambda: pl.BlockSpec((tm, Hp), lambda i, k: (i, 0))

    # Pass 1: h1 = relu(A @ XW1 + b1);  h1W2 = h1 @ W2  (emitted once per tile).
    h1, h1w2 = pl.pallas_call(
        _gcn1_stream_kernel,
        out_shape=(jax.ShapeDtypeStruct((P, Hp), bf16),
                   jax.ShapeDtypeStruct((P, Hp), bf16)),
        grid=grid,
        in_specs=[a_spec, res(P, Hp), res(1, Hp), res(Hp, Hp)],
        out_specs=(row(), row()),
        scratch_shapes=[pltpu.VMEM((tm, Hp), jnp.float32)],
        compiler_params=cparams,
    )(a_p, xw1p, b1p, w2p)

    # Pass 2: h2 = relu(A @ h1W2 + b2);  out = h1 @ Wl1 + h2 @ Wl2 + bl.
    out = pl.pallas_call(
        _gcn2_stream_kernel,
        out_shape=jax.ShapeDtypeStruct((P, Hp), jnp.float32),
        grid=grid,
        in_specs=[a_spec, res(P, Hp), row(), res(1, Hp),
                  res(Hp, Hp), res(Hp, Hp), res(1, Hp)],
        out_specs=pl.BlockSpec((tm, Hp), lambda i, k: (i, 0)),
        scratch_shapes=[pltpu.VMEM((tm, Hp), jnp.float32)],
        compiler_params=cparams,
    )(a_p, h1w2, h1, b2p, wl1p, wl2p, blp)

    return out[:N, :H]


def gnn_block_forward(x, a_norm, params, *, row_tile=None, k_tile=None,
                      force_streaming=False):
    """GNN_Block forward. `a_norm` is the dense normalized adjacency [N, N]."""
    W1, b1, W2, b2, Wl, bl = params
    N = x.shape[0]
    H = W1.shape[1]
    Hp = _round_up(H, LANE)

    vmem_cap = _vmem_capacity_bytes()
    big_vmem = vmem_cap >= 112 * 1024 * 1024   # v5e/v6e (128 MiB) vs v7x (64)

    # Fused fast path: conservative budget assumes inputs may be 2x-buffered.
    Nr = _round_up(max(N, SUBLANE), SUBLANE)
    fused_budget = (96 if big_vmem else 40) * 1024 * 1024
    fused_bytes = 4 * Nr * Nr + 12 * Nr * Hp * 4 + 2 * 1024 * 1024
    if not force_streaming and fused_bytes <= fused_budget:
        vmem_limit = int(min(vmem_cap - 8 * 2 ** 20, 100 * 2 ** 20))
        return _gnn_fused(x, a_norm, W1, b1, W2, b2, Wl, bl,
                          vmem_limit=vmem_limit)

    # Streaming path: generation-aware tiles / limits / pipeline depth.
    tm = max(16, _round_up(int(row_tile), 16)) if row_tile else \
        (512 if big_vmem else 256)
    tk = max(LANE, _round_up(int(k_tile), LANE)) if k_tile else 512
    # Guarantee >= 2 row tiles so both v7x TensorCores get work.
    while _round_up(max(N, tm * tk // math.gcd(tm, tk)),
                    tm * tk // math.gcd(tm, tk)) // tm < 2 and tm > 16:
        tm //= 2
    a_buffers = 3 if big_vmem else None        # deeper A pipeline on 128 MiB
    vmem_limit = int(min(vmem_cap - 16 * 2 ** 20, 100 * 2 ** 20))
    return _gnn_streaming(x, a_norm, W1, b1, W2, b2, Wl, bl, tm=tm, tk=tk,
                          a_buffers=a_buffers, vmem_limit=vmem_limit)


def reference_forward(x, a_norm, params):
    W1, b1, W2, b2, Wl, bl = params
    h1 = jax.nn.relu(a_norm @ (x @ W1) + b1)
    h2 = jax.nn.relu(a_norm @ (h1 @ W2) + b2)
    return jnp.concatenate([h1, h2], axis=-1) @ Wl + bl


def glorot(key, shape):
    fan_in, fan_out = shape
    lim = jnp.sqrt(6.0 / (fan_in + fan_out))
    return jax.random.uniform(key, shape, jnp.float32, -lim, lim)


if __name__ == "__main__":
    C_IN, HID = 8, 32
    key = jax.random.PRNGKey(0)
    k_w1, k_w2, k_wl, k_bl, k_data = jax.random.split(key, 5)

    # GCNConv: glorot weight, zero bias; Linear: glorot weight, small bias.
    W1 = glorot(k_w1, (C_IN, HID))
    b1 = jnp.zeros((HID,), jnp.float32)
    W2 = glorot(k_w2, (HID, HID))
    b2 = jnp.zeros((HID,), jnp.float32)
    Wl = glorot(k_wl, (2 * HID, HID))          # [in, out] for right-multiply
    bl = jax.random.uniform(k_bl, (HID,), jnp.float32, -0.1, 0.1)
    params = (W1, b1, W2, b2, Wl, bl)

    cases = [
        (16, 40, {}),                                            # fused, tiny
        (200, 800, {}),                                          # fused, N%16!=0
        (200, 800, dict(force_streaming=True,                    # streaming,
                        row_tile=128, k_tile=128)),              # 2x2 grid
    ]
    for idx, (N, E, kw) in enumerate(cases):
        k_x, k_e1, k_e2 = jax.random.split(jax.random.fold_in(k_data, idx), 3)
        x = jax.random.normal(k_x, (N, C_IN), jnp.float32)
        edge_index = jnp.stack([
            jax.random.randint(k_e1, (E,), 0, N),
            jax.random.randint(k_e2, (E,), 0, N),
        ]).astype(jnp.int32)

        # Dense normalized adjacency built ONCE per graph (x/param independent).
        A = gcn_norm_dense(edge_index, N)

        out = jax.block_until_ready(gnn_block_forward(x, A, params, **kw))
        ref = jax.block_until_ready(reference_forward(x, A, params))
        np.testing.assert_allclose(np.asarray(out), np.asarray(ref),
                                   rtol=2e-2, atol=2e-2)

    print("KERNEL_OK")
</pallas_src>

<mosaic_0001>
module attributes {stable_mosaic.version = 11 : i64} {
  func.func @_fused_kernel(%arg0: i32, %arg1: memref<16x16xbf16, #tpu.memory_space<vmem>>, %arg2: memref<16x128xbf16, #tpu.memory_space<vmem>>, %arg3: memref<1x128xf32, #tpu.memory_space<vmem>>, %arg4: memref<128x128xbf16, #tpu.memory_space<vmem>>, %arg5: memref<1x128xf32, #tpu.memory_space<vmem>>, %arg6: memref<128x128xbf16, #tpu.memory_space<vmem>>, %arg7: memref<128x128xbf16, #tpu.memory_space<vmem>>, %arg8: memref<1x128xf32, #tpu.memory_space<vmem>>, %arg9: memref<16x128xf32, #tpu.memory_space<vmem>>) attributes {dimension_semantics = [#tpu.dimension_semantics<arbitrary>], iteration_bounds = array<i64: 1>, scalar_prefetch = 0 : i64, scratch_operands = 0 : i64, tpu.core_type = #tpu.core_type<tc>, window_params = [{pipeline_mode = #tpu.pipeline_mode<synchronous>, transform_indices = @transform_0, window_bounds = array<i64: 16, 16>}, {pipeline_mode = #tpu.pipeline_mode<synchronous>, transform_indices = @transform_1, window_bounds = array<i64: 16, 128>}, {pipeline_mode = #tpu.pipeline_mode<synchronous>, transform_indices = @transform_2, window_bounds = array<i64: 1, 128>}, {pipeline_mode = #tpu.pipeline_mode<synchronous>, transform_indices = @transform_3, window_bounds = array<i64: 128, 128>}, {pipeline_mode = #tpu.pipeline_mode<synchronous>, transform_indices = @transform_4, window_bounds = array<i64: 1, 128>}, {pipeline_mode = #tpu.pipeline_mode<synchronous>, transform_indices = @transform_5, window_bounds = array<i64: 128, 128>}, {pipeline_mode = #tpu.pipeline_mode<synchronous>, transform_indices = @transform_6, window_bounds = array<i64: 128, 128>}, {pipeline_mode = #tpu.pipeline_mode<synchronous>, transform_indices = @transform_7, window_bounds = array<i64: 1, 128>}, {pipeline_mode = #tpu.pipeline_mode<synchronous>, transform_indices = @transform_8, window_bounds = array<i64: 16, 128>}]} {
    %c0 = arith.constant 0 : index
    %c0_0 = arith.constant 0 : index
    %0 = vector.load %arg1[%c0, %c0_0] : memref<16x16xbf16, #tpu.memory_space<vmem>>, vector<16x16xbf16>
    %c0_1 = arith.constant 0 : index
    %c0_2 = arith.constant 0 : index
    %1 = vector.load %arg2[%c0_1, %c0_2] : memref<16x128xbf16, #tpu.memory_space<vmem>>, vector<16x128xbf16>
    %cst = arith.constant dense<0.000000e+00> : vector<16x128xf32>
    %2 = tpu.matmul %0, %1, %cst {dimension_numbers = #tpu.dot_dimension_numbers<[1], [0], [0], [1], [0, 0, 1, 1], [], []>} : vector<16x16xbf16>, vector<16x128xbf16>, vector<16x128xf32> -> vector<16x128xf32>
    %c0_3 = arith.constant 0 : index
    %c0_4 = arith.constant 0 : index
    %3 = vector.load %arg3[%c0_3, %c0_4] : memref<1x128xf32, #tpu.memory_space<vmem>>, vector<1x128xf32>
    %4 = vector.broadcast %3 : vector<1x128xf32> to vector<16x128xf32>
    %5 = arith.addf %2, %4 : vector<16x128xf32>
    %cst_5 = arith.constant 0.000000e+00 : f32
    %6 = vector.broadcast %cst_5 : f32 to vector<16x128xf32>
    %7 = arith.maximumf %5, %6 : vector<16x128xf32>
    %8 = arith.truncf %7 : vector<16x128xf32> to vector<16x128xbf16>
    %c0_6 = arith.constant 0 : index
    %c0_7 = arith.constant 0 : index
    %9 = vector.load %arg4[%c0_6, %c0_7] : memref<128x128xbf16, #tpu.memory_space<vmem>>, vector<128x128xbf16>
    %cst_8 = arith.constant dense<0.000000e+00> : vector<16x128xf32>
    %10 = tpu.matmul %8, %9, %cst_8 {dimension_numbers = #tpu.dot_dimension_numbers<[1], [0], [0], [1], [0, 0, 1, 1], [], []>} : vector<16x128xbf16>, vector<128x128xbf16>, vector<16x128xf32> -> vector<16x128xf32>
    %11 = arith.truncf %10 : vector<16x128xf32> to vector<16x128xbf16>
    %c0_9 = arith.constant 0 : index
    %c0_10 = arith.constant 0 : index
    %12 = vector.load %arg1[%c0_9, %c0_10] : memref<16x16xbf16, #tpu.memory_space<vmem>>, vector<16x16xbf16>
    %cst_11 = arith.constant dense<0.000000e+00> : vector<16x128xf32>
    %13 = tpu.matmul %12, %11, %cst_11 {dimension_numbers = #tpu.dot_dimension_numbers<[1], [0], [0], [1], [0, 0, 1, 1], [], []>} : vector<16x16xbf16>, vector<16x128xbf16>, vector<16x128xf32> -> vector<16x128xf32>
    %c0_12 = arith.constant 0 : index
    %c0_13 = arith.constant 0 : index
    %14 = vector.load %arg5[%c0_12, %c0_13] : memref<1x128xf32, #tpu.memory_space<vmem>>, vector<1x128xf32>
    %15 = vector.broadcast %14 : vector<1x128xf32> to vector<16x128xf32>
    %16 = arith.addf %13, %15 : vector<16x128xf32>
    %cst_14 = arith.constant 0.000000e+00 : f32
    %17 = vector.broadcast %cst_14 : f32 to vector<16x128xf32>
    %18 = arith.maximumf %16, %17 : vector<16x128xf32>
    %c0_15 = arith.constant 0 : index
    %c0_16 = arith.constant 0 : index
    %19 = vector.load %arg6[%c0_15, %c0_16] : memref<128x128xbf16, #tpu.memory_space<vmem>>, vector<128x128xbf16>
    %cst_17 = arith.constant dense<0.000000e+00> : vector<16x128xf32>
    %20 = tpu.matmul %8, %19, %cst_17 {dimension_numbers = #tpu.dot_dimension_numbers<[1], [0], [0], [1], [0, 0, 1, 1], [], []>} : vector<16x128xbf16>, vector<128x128xbf16>, vector<16x128xf32> -> vector<16x128xf32>
    %21 = arith.truncf %18 : vector<16x128xf32> to vector<16x128xbf16>
    %c0_18 = arith.constant 0 : index
    %c0_19 = arith.constant 0 : index
    %22 = vector.load %arg7[%c0_18, %c0_19] : memref<128x128xbf16, #tpu.memory_space<vmem>>, vector<128x128xbf16>
    %cst_20 = arith.constant dense<0.000000e+00> : vector<16x128xf32>
    %23 = tpu.matmul %21, %22, %cst_20 {dimension_numbers = #tpu.dot_dimension_numbers<[1], [0], [0], [1], [0, 0, 1, 1], [], []>} : vector<16x128xbf16>, vector<128x128xbf16>, vector<16x128xf32> -> vector<16x128xf32>
    %24 = arith.addf %20, %23 : vector<16x128xf32>
    %c0_21 = arith.constant 0 : index
    %c0_22 = arith.constant 0 : index
    %25 = vector.load %arg8[%c0_21, %c0_22] : memref<1x128xf32, #tpu.memory_space<vmem>>, vector<1x128xf32>
    %26 = vector.broadcast %25 : vector<1x128xf32> to vector<16x128xf32>
    %27 = arith.addf %24, %26 : vector<16x128xf32>
    %c0_23 = arith.constant 0 : index
    %c0_24 = arith.constant 0 : index
    %28 = vector.load %arg9[%c0_23, %c0_24] : memref<16x128xf32, #tpu.memory_space<vmem>>, vector<16x128xf32>
    tpu.vector_store %arg9[%c0_23, %c0_24], %27 {strides = array<i32>} : memref<16x128xf32, #tpu.memory_space<vmem>>, vector<16x128xf32>,
    return
  }
  func.func @transform_0(%arg0: i32) -> (i32, i32) {
    %c0_i32 = arith.constant 0 : i32
    %c0_i32_0 = arith.constant 0 : i32
    %c0_i32_1 = arith.constant 0 : i32
    return %c0_i32, %c0_i32_0 : i32, i32
  }
  func.func @transform_1(%arg0: i32) -> (i32, i32) {
    %c0_i32 = arith.constant 0 : i32
    %c0_i32_0 = arith.constant 0 : i32
    %c0_i32_1 = arith.constant 0 : i32
    return %c0_i32, %c0_i32_0 : i32, i32
  }
  func.func @transform_2(%arg0: i32) -> (i32, i32) {
    %c0_i32 = arith.constant 0 : i32
    %c0_i32_0 = arith.constant 0 : i32
    %c0_i32_1 = arith.constant 0 : i32
    return %c0_i32, %c0_i32_0 : i32, i32
  }
  func.func @transform_3(%arg0: i32) -> (i32, i32) {
    %c0_i32 = arith.constant 0 : i32
    %c0_i32_0 = arith.constant 0 : i32
    %c0_i32_1 = arith.constant 0 : i32
    return %c0_i32, %c0_i32_0 : i32, i32
  }
  func.func @transform_4(%arg0: i32) -> (i32, i32) {
    %c0_i32 = arith.constant 0 : i32
    %c0_i32_0 = arith.constant 0 : i32
    %c0_i32_1 = arith.constant 0 : i32
    return %c0_i32, %c0_i32_0 : i32, i32
  }
  func.func @transform_5(%arg0: i32) -> (i32, i32) {
    %c0_i32 = arith.constant 0 : i32
    %c0_i32_0 = arith.constant 0 : i32
    %c0_i32_1 = arith.constant 0 : i32
    return %c0_i32, %c0_i32_0 : i32, i32
  }
  func.func @transform_6(%arg0: i32) -> (i32, i32) {
    %c0_i32 = arith.constant 0 : i32
    %c0_i32_0 = arith.constant 0 : i32
    %c0_i32_1 = arith.constant 0 : i32
    return %c0_i32, %c0_i32_0 : i32, i32
  }
  func.func @transform_7(%arg0: i32) -> (i32, i32) {
    %c0_i32 = arith.constant 0 : i32
    %c0_i32_0 = arith.constant 0 : i32
    %c0_i32_1 = arith.constant 0 : i32
    return %c0_i32, %c0_i32_0 : i32, i32
  }
  func.func @transform_8(%arg0: i32) -> (i32, i32) {
    %c0_i32 = arith.constant 0 : i32
    %c0_i32_0 = arith.constant 0 : i32
    %c0_i32_1 = arith.constant 0 : i32
    return %c0_i32, %c0_i32_0 : i32, i32
  }
}

</mosaic_0001>

<bundles_post_ra>
// kernel: _gnn_fused.1
= control target key start
LH: loop header
LB: loop body
LE: loop exit
PB: predicated region body
PF: predicated region fallthrough
CT: control target
= control target key end

     0   :  { %v684_v1 = vmov 0.0   ;;  %vm685_vm0 = vmmov 0   ;;  %vm53_vm1 = vcmask 130048   ;;  %s875_s0 = inlined_call_operand.vmem [shape: bf16[16,16], index: 0, kind: input, shape index: {}]   ;;  %s876_s1 = inlined_call_operand.vmem [shape: bf16[16,128], index: 1, kind: input, shape index: {}]   ;;  %s877_s2 = inlined_call_operand.vmem [shape: f32[1,128], index: 2, kind: input, shape index: {}]   ;;  %s878_s3 = inlined_call_operand.vmem [shape: bf16[128,128], index: 3, kind: input, shape index: {}]   ;;  %s879_s4 = inlined_call_operand.vmem [shape: f32[1,128], index: 4, kind: input, shape index: {}]   ;;  %s880_s5 = inlined_call_operand.vmem [shape: bf16[128,128], index: 5, kind: input, shape index: {}]   ;;  %s881_s6 = inlined_call_operand.vmem [shape: bf16[128,128], index: 6, kind: input, shape index: {}]   ;;  %s882_s7 = inlined_call_operand.vmem [shape: f32[1,128], index: 7, kind: input, shape index: {}]   ;;  %s883_s8 = inlined_call_operand.hbm [shape: f32[16,128], index: 8, kind: output, shape index: {}]  }
   0x1   :  { %v634_v0 = vld [vmem:[%s876_s1] sm:$0xff]   ;;  %557 = vmatprep.subr.bf16.mxu0 %v684_v1  ;;  %563 = vmatprep.subr.bf16.mxu1 %v684_v1  ;;  %v637_v4 = vld [vmem:[%s878_s3 + $0x8] sm:$0xff]   ;;  %v638_v5 = vld [vmem:[%s878_s3 + $0x10] sm:$0xff]  }
   0x2   :  { %v741_v2 = vld [vmem:[%s875_s0] sm:$0xff]   ;;  %558 = vmatpush3.bf16.msra.mxu0 %v634_v0  ;;  %559 = vmatprep.mubr.msk.bf16.mxu0 %vm685_vm0, %v684_v1  ;;  %v639_v6 = vld [vmem:[%s878_s3 + $0x18] sm:$0xff]   ;;  %v641_v8 = vld [vmem:[%s878_s3 + $0x28] sm:$0xff]  }
   0x3   :  { %v636_v3 = vld [vmem:[%s878_s3] sm:$0xff]   ;;  %579 = vmatprep.mubr.msk.bf16.mxu1 %vm685_vm0, %v684_v1  ;;  %583 = vmatprep.subr.bf16.mxu0 %v684_v1 }
   0x4   :  { %564 = vmatpush3.bf16.msra.mxu1 %v636_v3  ;;  %v640_v7 = vld [vmem:[%s878_s3 + $0x20] sm:$0xff]  }
   0x5   :  { %560 = vmatmul.mubr.msk.bf16.vlgmr.msra.gmra.mrb[0].mxu0 %vm53_vm1, %v741_v2  ;;  %565 = vmatprep.subr.bf16.mxu1 %v684_v1 }
   0x6   :  { %585 = vmatprep.mubr.msk.bf16.mxu0 %vm685_vm0, %v684_v1 }
   0x8   :  { %566 = vmatpush3.bf16.msra.mxu1 %v637_v4 }
   0x9   :  { %567 = vmatprep.subr.bf16.mxu1 %v684_v1 }
   0xc   :  { %568 = vmatpush3.bf16.msra.mxu1 %v638_v5 }
   0xd   :  { %569 = vmatprep.subr.bf16.mxu1 %v684_v1 }
  0x10   :  { %570 = vmatpush3.bf16.msra.mxu1 %v639_v6 }
  0x11   :  { %571 = vmatprep.subr.bf16.mxu1 %v684_v1 }
  0x14   :  { %572 = vmatpush3.bf16.msra.mxu1 %v640_v7 }
  0x15   :  { %13 = vsyncpa [#allocation3], 0  ;;  %573 = vmatprep.subr.bf16.mxu1 %v684_v1  ;;  %v642_v9 = vld [vmem:[%s878_s3 + $0x30] sm:$0xff]   ;;  %v643_v10 = vld [vmem:[%s878_s3 + $0x38] sm:$0xff]  }
  0x16   :  { %v495_v11 = vld [vmem:[%s877_s2] ss:$0 sm:$0xff]  ;;  %v645_v22 = vld [vmem:[%s880_s5 + $0x8] sm:$0xff]   ;;  %v646_v23 = vld [vmem:[%s880_s5 + $0x10] sm:$0xff]  }
  0x17   :  { %v644_v20 = vld [vmem:[%s880_s5] sm:$0xff]   ;;  %v647_v24 = vld [vmem:[%s880_s5 + $0x18] sm:$0xff]   ;;  %v649_v26 = vld [vmem:[%s880_s5 + $0x28] sm:$0xff]  }
  0x18   :  { %574 = vmatpush3.bf16.msra.mxu1 %v641_v8  ;;  %v648_v25 = vld [vmem:[%s880_s5 + $0x20] sm:$0xff]   ;;  %v650_v27 = vld [vmem:[%s880_s5 + $0x30] sm:$0xff]   ;;  %v651_v28 = vld [vmem:[%s880_s5 + $0x38] sm:$0xff]  }
  0x19   :  { %575 = vmatprep.subr.bf16.mxu1 %v684_v1  ;;  %v652_v34 = vld [vmem:[%s881_s6] sm:$0xff]   ;;  %v653_v35 = vld [vmem:[%s881_s6 + $0x8] sm:$0xff]   ;;  %v654_v36 = vld [vmem:[%s881_s6 + $0x10] sm:$0xff]  }
  0x1a   :  { %v655_v37 = vld [vmem:[%s881_s6 + $0x18] sm:$0xff]   ;;  %v656_v38 = vld [vmem:[%s881_s6 + $0x20] sm:$0xff]   ;;  %v657_v39 = vld [vmem:[%s881_s6 + $0x28] sm:$0xff]  }
  0x1b   :  { %v658_v44 = vld [vmem:[%s881_s6 + $0x30] sm:$0xff]   ;;  %v659_v45 = vld [vmem:[%s881_s6 + $0x38] sm:$0xff]   ;;  %v507_v46 = vld [vmem:[%s879_s4] ss:$0 sm:$0xff]  ;;  %s686_s6 = smov [#allocation2]  }
  0x1c   :  { %576 = vmatpush3.bf16.msra.mxu1 %v642_v9  ;;  %v525_v57 = vld [vmem:[%s882_s7] ss:$0 sm:$0xff]  ;;  %s484_s4 = sshll.u32 %s686_s6, 4  ;;  %s485_s4 = int_to_ptr.vmem [resolvable:$true] %s484_s4 }
  0x1d   :  { %577 = vmatprep.subr.bf16.mxu1 %v684_v1  ;;  %s660_s10 = scalar_lea.vmem %s485_s4, 256  ;;  %p665_p1 = scmp.lt.s32.totalorder %s485_s4, %s485_s4 }
  0x1e   :  { %p661_p0 = scmp.ne.s32.totalorder %s485_s4, %s660_s10  ;;  %p666_p2 = scmp.lt.s32.totalorder %s660_s10, %s660_s10 }
  0x20   :  { %578 = vmatpush3.bf16.msra.mxu1 %v643_v10  ;;  %p667_p3 = por %p666_p2, %p665_p1 }
  0x21   :  { %609 = vmatprep.subr.bf16.mxu1 %v684_v1 }
  0x22   :  { %p668_p4 = pnand %p667_p3, %p661_p0 }
  0xd8   :  { %v91_v12 = vpop.f32.mrb[0].mxu0 }
  0xd9   :  { %v92_v13 = vadd.f32 %v495_v11, %v91_v12  ;;  %v561_v14 = vpop.f32.mrb[1].mxu0 }
  0xda   :  { %v94_v15 = vpop.f32.mrb[2].mxu0 }
  0xdb   :  { %v95_v16 = vadd.f32 %v495_v11, %v94_v15  ;;  %v562_v17 = vpop.f32.mrb[3].mxu0  ;;  %v98_v18 = vmax.f32 %v92_v13, 0.0 }
  0xdd   :  { %v99_v19 = vmax.f32 %v95_v16, 0.0 }
  0xdf   :  { %v100_v21 = vpack.c.bf16 %v99_v19, %v98_v18 }
  0xe1   :  { %580 = vmatmul.mubr.bf16.vlgmr.msra.gmra.mrb[0].mxu1 %v100_v21 }
  0xe2   :  { %610 = vmatpush3.bf16.msra.mxu1 %v644_v20  ;;  %625 = vmatprep.mubr.msk.bf16.mxu1 %vm685_vm0, %v684_v1 }
  0xe3   :  { %611 = vmatprep.subr.bf16.mxu1 %v684_v1 }
  0xe6   :  { %612 = vmatpush3.bf16.msra.mxu1 %v645_v22 }
  0xe7   :  { %613 = vmatprep.subr.bf16.mxu1 %v684_v1 }
  0xea   :  { %614 = vmatpush3.bf16.msra.mxu1 %v646_v23 }
  0xeb   :  { %615 = vmatprep.subr.bf16.mxu1 %v684_v1 }
  0xee   :  { %616 = vmatpush3.bf16.msra.mxu1 %v647_v24 }
  0xef   :  { %617 = vmatprep.subr.bf16.mxu1 %v684_v1 }
  0xf2   :  { %618 = vmatpush3.bf16.msra.mxu1 %v648_v25 }
  0xf3   :  { %619 = vmatprep.subr.bf16.mxu1 %v684_v1 }
  0xf6   :  { %620 = vmatpush3.bf16.msra.mxu1 %v649_v26 }
  0xf7   :  { %621 = vmatprep.subr.bf16.mxu1 %v684_v1 }
  0xfa   :  { %622 = vmatpush3.bf16.msra.mxu1 %v650_v27 }
  0xfb   :  { %623 = vmatprep.subr.bf16.mxu1 %v684_v1 }
  0xfe   :  { %624 = vmatpush3.bf16.msra.mxu1 %v651_v28 }
 0x101   :  { %626 = vmatmul.mubr.bf16.vlgmr.msra.gmra.mrb[4].mxu1 %v100_v21 }
 0x1b4   :  { %v199_v29 = vpop.f32.mrb[0].mxu1 }
 0x1b5   :  { %v581_v30 = vpop.f32.mrb[1].mxu1 }
 0x1b6   :  { %v202_v31 = vpop.f32.mrb[2].mxu1 }
 0x1b7   :  { %v206_v32 = vpack.c.bf16 %v202_v31, %v199_v29  ;;  %v582_v33 = vpop.f32.mrb[3].mxu1 }
 0x1b9   :  { %584 = vmatpush3.bf16.msra.mxu0 %v206_v32 }
 0x1ba   :  { %589 = vmatprep.subr.bf16.mxu0 %v684_v1 }
 0x1bc   :  { %586 = vmatmul.mubr.msk.bf16.vlgmr.msra.gmra.mrb[4].mxu0 %vm53_vm1, %v741_v2 }
 0x1bd   :  { %590 = vmatpush3.bf16.msra.mxu0 %v652_v34  ;;  %605 = vmatprep.mubr.msk.bf16.mxu0 %vm685_vm0, %v684_v1 }
 0x1be   :  { %591 = vmatprep.subr.bf16.mxu0 %v684_v1 }
 0x1c1   :  { %592 = vmatpush3.bf16.msra.mxu0 %v653_v35 }
 0x1c2   :  { %593 = vmatprep.subr.bf16.mxu0 %v684_v1 }
 0x1c5   :  { %594 = vmatpush3.bf16.msra.mxu0 %v654_v36 }
 0x1c6   :  { %595 = vmatprep.subr.bf16.mxu0 %v684_v1 }
 0x1c9   :  { %596 = vmatpush3.bf16.msra.mxu0 %v655_v37 }
 0x1ca   :  { %597 = vmatprep.subr.bf16.mxu0 %v684_v1 }
 0x1cd   :  { %598 = vmatpush3.bf16.msra.mxu0 %v656_v38 }
 0x1ce   :  { %599 = vmatprep.subr.bf16.mxu0 %v684_v1 }
 0x1d1   :  { %600 = vmatpush3.bf16.msra.mxu0 %v657_v39 }
 0x1d2   :  { %601 = vmatprep.subr.bf16.mxu0 %v684_v1 }
 0x1d4   :  { %v461_v40 = vpop.f32.mrb[4].mxu1 }
 0x1d5   :  { %v627_v41 = vpop.f32.mrb[5].mxu1  ;;  %602 = vmatpush3.bf16.msra.mxu0 %v658_v44 }
 0x1d6   :  { %v464_v42 = vpop.f32.mrb[6].mxu1  ;;  %603 = vmatprep.subr.bf16.mxu0 %v684_v1 }
 0x1d7   :  { %v628_v43 = vpop.f32.mrb[7].mxu1 }
 0x1d9   :  { %604 = vmatpush3.bf16.msra.mxu0 %v659_v45 }
 0x28f   :  { %v248_v47 = vpop.f32.mrb[4].mxu0 }
 0x290   :  { %v249_v48 = vadd.f32 %v507_v46, %v248_v47  ;;  %v587_v49 = vpop.f32.mrb[5].mxu0 }
 0x291   :  { %v251_v50 = vpop.f32.mrb[6].mxu0 }
 0x292   :  { %v252_v51 = vadd.f32 %v507_v46, %v251_v50  ;;  %v588_v52 = vpop.f32.mrb[7].mxu0  ;;  %v255_v53 = vmax.f32 %v249_v48, 0.0 }
 0x294   :  { %v256_v54 = vmax.f32 %v252_v51, 0.0 }
 0x296   :  { %v273_v55 = vpack.c.bf16 %v256_v54, %v255_v53 }
 0x298   :  { %606 = vmatmul.mubr.bf16.vlgmr.msra.gmra.mrb[8].mxu0 %v273_v55 }
 0x36b   :  { %v372_v56 = vpop.f32.mrb[8].mxu0 }
 0x36c   :  { %v462_v58 = vadd.f32 %v461_v40, %v372_v56  ;;  %v607_v59 = vpop.f32.mrb[9].mxu0 }
 0x36d   :  { %v375_v60 = vpop.f32.mrb[10].mxu0 }
 0x36e   :  { %v475_v61 = vadd.f32 %v525_v57, %v462_v58  ;;  %v465_v62 = vadd.f32 %v464_v42, %v375_v60  ;;  %v608_v63 = vpop.f32.mrb[11].mxu0 }
 0x370   :  { %477 = vst [vmem:[#allocation2] sm:$0xff] %v475_v61  ;;  %v476_v0 = vadd.f32 %v525_v57, %v465_v62 }
 0x372   :  { %478 = vst [vmem:[#allocation2 + $0x8] sm:$0xff] %v476_v0 }
 0x373   :  { %671 = shalt.err (!%p668_p4)
}
 0x374   :  { %s672_s1 = scalar_lea.hbm %s883_s8, 256 }
 0x375   :  { %p673_p5 = scmp.ne.s32.totalorder %s883_s8, %s672_s1  ;;  %p676_p6 = scmp.lt.u32.totalorder %s672_s1, %s883_s8 }
 0x377   :  { %p678_p7 = pnand %p676_p6, %p673_p5 }
 0x379   :  { %681 = shalt.err (!%p678_p7)
}
 0x37a   :  { %s687_s15 = smov 128   ;;  %s688_s16 = smov 8  }
 0x37b   :  { %490 = dma.vmem_to_hbm [thread:$0]  %s485_s4, 256, %s883_s8, [#allocation3], %s687_s15, %s687_s15, %s688_s16  }
 0x37c   :  { %682 = dma.done.wait [#allocation3], 256  }
 0x37d   :  { %683 = vsyncadd [#allocation3], 4294967040 }
 0x37e   :  { %494 = vsyncpa [#allocation3], 1 }

</bundles_post_ra>
